<compile_context>
chip_gen: v7x
topology: tpu7x:2x2x1
jax: 0.10.0
libtpu: 0.0.40
codegen_flags: <defaults>
</compile_context>

<pallas_src>
import functools
import math

import jax
import jax.numpy as jnp
import numpy as np
from jax.experimental import pallas as pl
from jax.experimental.pallas import tpu as pltpu


# ---------------------------------------------------------------------------
# index maps (scalar-prefetch refs are passed positionally and ignored)
# ---------------------------------------------------------------------------
def _mask_index_map(i, params, flops_dil, flops_std, t_layer):
    del params, flops_dil, flops_std, t_layer
    return (i, 0, 0)


def _out_index_map(i, params, flops_dil, flops_std, t_layer):
    del i, params, flops_dil, flops_std, t_layer
    return (0, 0)


# ---------------------------------------------------------------------------
# kernel
# ---------------------------------------------------------------------------
def _sparsity_loss_kernel(
    params_ref,      # SMEM (3,)  [upper_bound, lower_bound, sparsity_target]
    flops_dil_ref,   # SMEM (L,)  dilate flops_per_position
    flops_std_ref,   # SMEM (L,)  std    flops_per_position
    t_layer_ref,     # SMEM (L,)  per-layer capacity tot_dil*f_dil + tot_std*f_std
    mask_dil_ref,    # VMEM (B, HW) this layer's dilate hard mask
    mask_std_ref,    # VMEM (B, HW) this layer's std    hard mask
    out_ref,         # VMEM (1, 1) loss
    acc_block_ref,   # VMEM (1, 1) scratch: running sum of per-layer hinge losses
    acc_cost_ref,    # VMEM (1, 1) scratch: running sum of c_i
    acc_total_ref,   # VMEM (1, 1) scratch: running sum of t_i
    *,
    num_layers,
):
    i = pl.program_id(0)

    @pl.when(i == 0)
    def _init():
        acc_block_ref[...] = jnp.zeros_like(acc_block_ref)
        acc_cost_ref[...] = jnp.zeros_like(acc_cost_ref)
        acc_total_ref[...] = jnp.zeros_like(acc_total_ref)

    upper = params_ref[0]
    lower = params_ref[1]

    # In-kernel mask reductions: this is the real HBM traffic the launch
    # overhead is amortized over.
    act_dil = jnp.sum(mask_dil_ref[...].astype(jnp.float32))
    act_std = jnp.sum(mask_std_ref[...].astype(jnp.float32))

    c = act_dil * flops_dil_ref[i] + act_std * flops_std_ref[i]
    t = t_layer_ref[i]

    layer_perc = c / t
    over = jnp.maximum(layer_perc - upper, 0.0)
    under = jnp.maximum(lower - layer_perc, 0.0)

    acc_block_ref[...] = acc_block_ref[...] + (over * over + under * under)
    acc_cost_ref[...] = acc_cost_ref[...] + c
    acc_total_ref[...] = acc_total_ref[...] + t

    @pl.when(i == num_layers - 1)
    def _finalize():
        target = params_ref[2]
        loss_block = acc_block_ref[...] * (1.0 / num_layers)
        perc = acc_cost_ref[...] / acc_total_ref[...]
        diff = perc - target
        out_ref[...] = diff * diff + loss_block


# ---------------------------------------------------------------------------
# jitted launcher (stack / reshape of device masks fuses with the pallas call)
# ---------------------------------------------------------------------------
@jax.jit
def _launch(params, flops_dil, flops_std, t_layer, masks_dil, masks_std):
    num_layers = len(masks_dil)
    b = masks_dil[0].shape[0]
    md = jnp.stack(masks_dil).astype(jnp.float32).reshape(num_layers, b, -1)
    ms = jnp.stack(masks_std).astype(jnp.float32).reshape(num_layers, b, -1)
    hw = md.shape[-1]

    kernel = functools.partial(_sparsity_loss_kernel, num_layers=num_layers)

    out = pl.pallas_call(
        kernel,
        out_shape=jax.ShapeDtypeStruct((1, 1), jnp.float32),
        grid_spec=pltpu.PrefetchScalarGridSpec(
            num_scalar_prefetch=4,
            grid=(num_layers,),
            in_specs=[
                pl.BlockSpec((None, b, hw), _mask_index_map),
                pl.BlockSpec((None, b, hw), _mask_index_map),
            ],
            out_specs=pl.BlockSpec((1, 1), _out_index_map),
            scratch_shapes=[
                pltpu.VMEM((1, 1), jnp.float32),  # sum of hinge losses
                pltpu.VMEM((1, 1), jnp.float32),  # sum of c_i
                pltpu.VMEM((1, 1), jnp.float32),  # sum of t_i
            ],
        ),
        compiler_params=pltpu.CompilerParams(
            # Layer axis carries the scratch accumulators -> reduction axis.
            # TODO(synk): a v7x megacore split of the layer axis needs per-core
            # partial accumulators + a combine step; kept "arbitrary" for
            # correctness on all generations.
            dimension_semantics=("arbitrary",),
        ),
    )(params, flops_dil, flops_std, t_layer, md, ms)
    return out[0, 0]


# ---------------------------------------------------------------------------
# public wrapper mirroring SparsityCriterionMulti.forward(meta)
# ---------------------------------------------------------------------------
def sparsity_criterion_multi(meta, sparsity_target, num_epochs):
    """meta["masks"][i]["dilate"|"std"] holds:
       "hard": device array (B,1,H,W) hard mask (0/1)   -- stays on device,
       "flops_per_position", "total_positions": Python floats (layer config)."""
    # Annealing schedule: pure scalar math on epoch counters (host, as in torch).
    p = meta["epoch"] / (0.33 * num_epochs)
    progress = math.cos(min(max(p, 0.0), 1.0) * (math.pi / 2)) ** 2
    upper_bound = 1.0 - progress * (1.0 - sparsity_target)
    lower_bound = progress * sparsity_target

    masks = meta["masks"]

    # Per-layer hard masks stay device arrays: no device->host sync anywhere.
    masks_dil = tuple(m["dilate"]["hard"] for m in masks)
    masks_std = tuple(m["std"]["hard"] for m in masks)

    # flops / total positions are host Python scalars in dynconv -> tiny SMEM tables.
    flops_dil = np.asarray([m["dilate"]["flops_per_position"] for m in masks], np.float32)
    flops_std = np.asarray([m["std"]["flops_per_position"] for m in masks], np.float32)
    t_layer = np.asarray(
        [
            m["dilate"]["total_positions"] * m["dilate"]["flops_per_position"]
            + m["std"]["total_positions"] * m["std"]["flops_per_position"]
            for m in masks
        ],
        np.float32,
    )
    params = np.asarray([upper_bound, lower_bound, sparsity_target], np.float32)

    # TODO(synk): for v5e HBM-bandwidth, masks could be shipped int8/bit-packed
    # and widened in-VMEM; kept f32 to match dynconv's float hard masks.
    return _launch(params, flops_dil, flops_std, t_layer, masks_dil, masks_std)


# ---------------------------------------------------------------------------
# pure-Python float64 reference mirroring the PyTorch forward
# ---------------------------------------------------------------------------
def _reference_loss(meta, sparsity_target, num_epochs):
    p = meta["epoch"] / (0.33 * num_epochs)
    progress = math.cos(min(max(p, 0.0), 1.0) * (math.pi / 2)) ** 2
    upper_bound = 1.0 - progress * (1.0 - sparsity_target)
    lower_bound = progress * sparsity_target

    loss_block, cost, total = 0.0, 0.0, 0.0
    for mask in meta["masks"]:
        m_dil, m = mask["dilate"], mask["std"]
        act_dil = float(np.sum(np.asarray(m_dil["hard"], dtype=np.float64)))
        act_std = float(np.sum(np.asarray(m["hard"], dtype=np.float64)))
        c = act_dil * m_dil["flops_per_position"] + act_std * m["flops_per_position"]
        t = (m_dil["total_positions"] * m_dil["flops_per_position"]
             + m["total_positions"] * m["flops_per_position"])
        layer_perc = c / t
        assert 0.0 <= layer_perc <= 1.0, layer_perc
        loss_block += max(0.0, layer_perc - upper_bound) ** 2
        loss_block += max(0.0, lower_bound - layer_perc) ** 2
        cost += c
        total += t
    perc = cost / total
    assert 0.0 <= perc <= 1.0, perc
    loss_block /= len(meta["masks"])
    loss_network = (perc - sparsity_target) ** 2
    return loss_network + loss_block


if __name__ == "__main__":
    # Deterministic synthetic meta; shapes consistent with dynconv masks
    # (batch=2, spatial 16x16, 8 residual blocks).
    key = jax.random.PRNGKey(0)
    B, H, W = 2, 16, 16
    L = 8

    sparsity_target = 0.5
    num_epochs = 100
    epoch = 10

    masks = []
    for i in range(L):
        key, k1, k2 = jax.random.split(key, 3)
        hard_dil = (jax.random.uniform(k1, (B, 1, H, W)) < 0.6).astype(jnp.float32)
        hard_std = (jax.random.uniform(k2, (B, 1, H, W)) < 0.4).astype(jnp.float32)
        total_positions = float(B * H * W)
        masks.append(
            {
                "dilate": {
                    "hard": hard_dil,                       # device array, never synced
                    "flops_per_position": float(9 * 64 * 64 * (i + 1)),
                    "total_positions": total_positions,
                },
                "std": {
                    "hard": hard_std,
                    "flops_per_position": float(9 * 64 * 64 * (i + 1) * 2),
                    "total_positions": total_positions,
                },
            }
        )

    meta = {
        "epoch": epoch,
        "masks": masks,
        "target_density": sparsity_target,
        # TODO(synk): torch-side logger.add(...) calls are side-effect logging only; omitted.
    }

    loss = sparsity_criterion_multi(meta, sparsity_target, num_epochs)
    loss = jax.block_until_ready(loss)

    ref = _reference_loss(meta, sparsity_target, num_epochs)
    assert abs(float(loss) - ref) < 1e-5 * max(1.0, abs(ref)), (float(loss), ref)

    print("KERNEL_OK")
</pallas_src>

<mosaic_0001>
module attributes {stable_mosaic.version = 11 : i64} {
  func.func @_sparsity_loss_kernel(%arg0: i32, %arg1: memref<3xf32, #tpu.memory_space<smem>>, %arg2: memref<8xf32, #tpu.memory_space<smem>>, %arg3: memref<8xf32, #tpu.memory_space<smem>>, %arg4: memref<8xf32, #tpu.memory_space<smem>>, %arg5: memref<1x2x256xf32, #tpu.memory_space<vmem>>, %arg6: memref<1x2x256xf32, #tpu.memory_space<vmem>>, %arg7: memref<1x1xf32, #tpu.memory_space<vmem>>, %arg8: memref<1x1xf32, #tpu.memory_space<vmem>>, %arg9: memref<1x1xf32, #tpu.memory_space<vmem>>, %arg10: memref<1x1xf32, #tpu.memory_space<vmem>>) attributes {dimension_semantics = [#tpu.dimension_semantics<arbitrary>], iteration_bounds = array<i64: 8>, scalar_prefetch = 4 : i64, scratch_operands = 3 : i64, tpu.core_type = #tpu.core_type<tc>, window_params = [{transform_indices = @transform_0, window_bounds = array<i64: 1, 2, 256>}, {transform_indices = @transform_1, window_bounds = array<i64: 1, 2, 256>}, {pipeline_mode = #tpu.pipeline_mode<synchronous>, transform_indices = @transform_2, window_bounds = array<i64: 1, 1>}]} {
    %c0_i32 = arith.constant 0 : i32
    %0 = arith.cmpi eq, %arg0, %c0_i32 : i32
    %1 = arith.extui %0 : i1 to i32
    %c0_i32_0 = arith.constant 0 : i32
    %2 = arith.cmpi ne, %1, %c0_i32_0 : i32
    scf.if %2 {
      %cst_23 = arith.constant 0.000000e+00 : f32
      %49 = vector.broadcast %cst_23 : f32 to vector<1x1xf32>
      %c0_24 = arith.constant 0 : index
      %c0_25 = arith.constant 0 : index
      %50 = vector.load %arg8[%c0_24, %c0_25] : memref<1x1xf32, #tpu.memory_space<vmem>>, vector<1x1xf32>
      tpu.vector_store %arg8[%c0_24, %c0_25], %49 {strides = array<i32>} : memref<1x1xf32, #tpu.memory_space<vmem>>, vector<1x1xf32>,
      %cst_26 = arith.constant 0.000000e+00 : f32
      %51 = vector.broadcast %cst_26 : f32 to vector<1x1xf32>
      %c0_27 = arith.constant 0 : index
      %c0_28 = arith.constant 0 : index
      %52 = vector.load %arg9[%c0_27, %c0_28] : memref<1x1xf32, #tpu.memory_space<vmem>>, vector<1x1xf32>
      tpu.vector_store %arg9[%c0_27, %c0_28], %51 {strides = array<i32>} : memref<1x1xf32, #tpu.memory_space<vmem>>, vector<1x1xf32>,
      %cst_29 = arith.constant 0.000000e+00 : f32
      %53 = vector.broadcast %cst_29 : f32 to vector<1x1xf32>
      %c0_30 = arith.constant 0 : index
      %c0_31 = arith.constant 0 : index
      %54 = vector.load %arg10[%c0_30, %c0_31] : memref<1x1xf32, #tpu.memory_space<vmem>>, vector<1x1xf32>
      tpu.vector_store %arg10[%c0_30, %c0_31], %53 {strides = array<i32>} : memref<1x1xf32, #tpu.memory_space<vmem>>, vector<1x1xf32>,
    } else {
    }
    %c0 = arith.constant 0 : index
    %3 = memref.load %arg1[%c0] : memref<3xf32, #tpu.memory_space<smem>>
    %c1 = arith.constant 1 : index
    %4 = memref.load %arg1[%c1] : memref<3xf32, #tpu.memory_space<smem>>
    %c0_1 = arith.constant 0 : index
    %c0_2 = arith.constant 0 : index
    %c0_3 = arith.constant 0 : index
    %5 = vector.load %arg5[%c0_1, %c0_2, %c0_3] : memref<1x2x256xf32, #tpu.memory_space<vmem>>, vector<1x2x256xf32>
    %6 = vector.shape_cast %5 : vector<1x2x256xf32> to vector<2x256xf32>
    %7 = vector.shape_cast %6 : vector<2x256xf32> to vector<1x2x256xf32>
    %cst = arith.constant dense<0.000000e+00> : vector<1xf32>
    %8 = vector.multi_reduction <add>, %7, %cst [1, 2] : vector<1x2x256xf32> to vector<1xf32>
    %9 = vector.shape_cast %8 : vector<1xf32> to vector<1x1x1xf32>
    %10 = vector.extract %9[0, 0, 0] : f32 from vector<1x1x1xf32>
    %c0_4 = arith.constant 0 : index
    %c0_5 = arith.constant 0 : index
    %c0_6 = arith.constant 0 : index
    %11 = vector.load %arg6[%c0_4, %c0_5, %c0_6] : memref<1x2x256xf32, #tpu.memory_space<vmem>>, vector<1x2x256xf32>
    %12 = vector.shape_cast %11 : vector<1x2x256xf32> to vector<2x256xf32>
    %13 = vector.shape_cast %12 : vector<2x256xf32> to vector<1x2x256xf32>
    %cst_7 = arith.constant dense<0.000000e+00> : vector<1xf32>
    %14 = vector.multi_reduction <add>, %13, %cst_7 [1, 2] : vector<1x2x256xf32> to vector<1xf32>
    %15 = vector.shape_cast %14 : vector<1xf32> to vector<1x1x1xf32>
    %16 = vector.extract %15[0, 0, 0] : f32 from vector<1x1x1xf32>
    %17 = arith.index_cast %arg0 : i32 to index
    %18 = memref.load %arg2[%17] : memref<8xf32, #tpu.memory_space<smem>>
    %19 = arith.mulf %10, %18 : f32
    %20 = arith.index_cast %arg0 : i32 to index
    %21 = memref.load %arg3[%20] : memref<8xf32, #tpu.memory_space<smem>>
    %22 = arith.mulf %16, %21 : f32
    %23 = arith.addf %19, %22 : f32
    %24 = arith.index_cast %arg0 : i32 to index
    %25 = memref.load %arg4[%24] : memref<8xf32, #tpu.memory_space<smem>>
    %26 = arith.divf %23, %25 : f32
    %27 = arith.subf %26, %3 : f32
    %cst_8 = arith.constant 0.000000e+00 : f32
    %28 = arith.maximumf %27, %cst_8 : f32
    %29 = arith.subf %4, %26 : f32
    %cst_9 = arith.constant 0.000000e+00 : f32
    %30 = arith.maximumf %29, %cst_9 : f32
    %c0_10 = arith.constant 0 : index
    %c0_11 = arith.constant 0 : index
    %31 = vector.load %arg8[%c0_10, %c0_11] : memref<1x1xf32, #tpu.memory_space<vmem>>, vector<1x1xf32>
    %32 = arith.mulf %28, %28 : f32
    %33 = arith.mulf %30, %30 : f32
    %34 = arith.addf %32, %33 : f32
    %35 = vector.broadcast %34 : f32 to vector<1x1xf32>
    %36 = arith.addf %31, %35 : vector<1x1xf32>
    %c0_12 = arith.constant 0 : index
    %c0_13 = arith.constant 0 : index
    %37 = vector.load %arg8[%c0_12, %c0_13] : memref<1x1xf32, #tpu.memory_space<vmem>>, vector<1x1xf32>
    tpu.vector_store %arg8[%c0_12, %c0_13], %36 {strides = array<i32>} : memref<1x1xf32, #tpu.memory_space<vmem>>, vector<1x1xf32>,
    %c0_14 = arith.constant 0 : index
    %c0_15 = arith.constant 0 : index
    %38 = vector.load %arg9[%c0_14, %c0_15] : memref<1x1xf32, #tpu.memory_space<vmem>>, vector<1x1xf32>
    %39 = vector.broadcast %23 : f32 to vector<1x1xf32>
    %40 = arith.addf %38, %39 : vector<1x1xf32>
    %c0_16 = arith.constant 0 : index
    %c0_17 = arith.constant 0 : index
    %41 = vector.load %arg9[%c0_16, %c0_17] : memref<1x1xf32, #tpu.memory_space<vmem>>, vector<1x1xf32>
    tpu.vector_store %arg9[%c0_16, %c0_17], %40 {strides = array<i32>} : memref<1x1xf32, #tpu.memory_space<vmem>>, vector<1x1xf32>,
    %c0_18 = arith.constant 0 : index
    %c0_19 = arith.constant 0 : index
    %42 = vector.load %arg10[%c0_18, %c0_19] : memref<1x1xf32, #tpu.memory_space<vmem>>, vector<1x1xf32>
    %43 = vector.broadcast %25 : f32 to vector<1x1xf32>
    %44 = arith.addf %42, %43 : vector<1x1xf32>
    %c0_20 = arith.constant 0 : index
    %c0_21 = arith.constant 0 : index
    %45 = vector.load %arg10[%c0_20, %c0_21] : memref<1x1xf32, #tpu.memory_space<vmem>>, vector<1x1xf32>
    tpu.vector_store %arg10[%c0_20, %c0_21], %44 {strides = array<i32>} : memref<1x1xf32, #tpu.memory_space<vmem>>, vector<1x1xf32>,
    %c7_i32 = arith.constant 7 : i32
    %46 = arith.cmpi eq, %arg0, %c7_i32 : i32
    %47 = arith.extui %46 : i1 to i32
    %c0_i32_22 = arith.constant 0 : i32
    %48 = arith.cmpi ne, %47, %c0_i32_22 : i32
    scf.if %48 {
      %c2 = arith.constant 2 : index
      %49 = memref.load %arg1[%c2] : memref<3xf32, #tpu.memory_space<smem>>
      %c0_23 = arith.constant 0 : index
      %c0_24 = arith.constant 0 : index
      %50 = vector.load %arg8[%c0_23, %c0_24] : memref<1x1xf32, #tpu.memory_space<vmem>>, vector<1x1xf32>
      %cst_25 = arith.constant 1.250000e-01 : f32
      %51 = vector.broadcast %cst_25 : f32 to vector<1x1xf32>
      %52 = arith.mulf %50, %51 : vector<1x1xf32>
      %c0_26 = arith.constant 0 : index
      %c0_27 = arith.constant 0 : index
      %53 = vector.load %arg9[%c0_26, %c0_27] : memref<1x1xf32, #tpu.memory_space<vmem>>, vector<1x1xf32>
      %c0_28 = arith.constant 0 : index
      %c0_29 = arith.constant 0 : index
      %54 = vector.load %arg10[%c0_28, %c0_29] : memref<1x1xf32, #tpu.memory_space<vmem>>, vector<1x1xf32>
      %55 = arith.divf %53, %54 : vector<1x1xf32>
      %56 = vector.broadcast %49 : f32 to vector<1x1xf32>
      %57 = arith.subf %55, %56 : vector<1x1xf32>
      %58 = arith.mulf %57, %57 : vector<1x1xf32>
      %59 = arith.addf %58, %52 : vector<1x1xf32>
      %c0_30 = arith.constant 0 : index
      %c0_31 = arith.constant 0 : index
      %60 = vector.load %arg7[%c0_30, %c0_31] : memref<1x1xf32, #tpu.memory_space<vmem>>, vector<1x1xf32>
      tpu.vector_store %arg7[%c0_30, %c0_31], %59 {strides = array<i32>} : memref<1x1xf32, #tpu.memory_space<vmem>>, vector<1x1xf32>,
    } else {
    }
    return
  }
  func.func @transform_0(%arg0: i32, %arg1: memref<3xf32, #tpu.memory_space<smem>>, %arg2: memref<8xf32, #tpu.memory_space<smem>>, %arg3: memref<8xf32, #tpu.memory_space<smem>>, %arg4: memref<8xf32, #tpu.memory_space<smem>>) -> (i32, i32, i32) {
    %c0_i32 = arith.constant 0 : i32
    %c0_i32_0 = arith.constant 0 : i32
    %c0_i32_1 = arith.constant 0 : i32
    return %arg0, %c0_i32, %c0_i32_0 : i32, i32, i32
  }
  func.func @transform_1(%arg0: i32, %arg1: memref<3xf32, #tpu.memory_space<smem>>, %arg2: memref<8xf32, #tpu.memory_space<smem>>, %arg3: memref<8xf32, #tpu.memory_space<smem>>, %arg4: memref<8xf32, #tpu.memory_space<smem>>) -> (i32, i32, i32) {
    %c0_i32 = arith.constant 0 : i32
    %c0_i32_0 = arith.constant 0 : i32
    %c0_i32_1 = arith.constant 0 : i32
    return %arg0, %c0_i32, %c0_i32_0 : i32, i32, i32
  }
  func.func @transform_2(%arg0: i32, %arg1: memref<3xf32, #tpu.memory_space<smem>>, %arg2: memref<8xf32, #tpu.memory_space<smem>>, %arg3: memref<8xf32, #tpu.memory_space<smem>>, %arg4: memref<8xf32, #tpu.memory_space<smem>>) -> (i32, i32) {
    %c0_i32 = arith.constant 0 : i32
    %c0_i32_0 = arith.constant 0 : i32
    %c0_i32_1 = arith.constant 0 : i32
    return %c0_i32, %c0_i32_0 : i32, i32
  }
}

</mosaic_0001>

<bundles_post_ra>
// kernel: _launch.1
= control target key start
LH: loop header
LB: loop body
LE: loop exit
PB: predicated region body
PF: predicated region fallthrough
CT: control target
= control target key end

     0   :  { %s581_s0 = inlined_call_operand.vmem [shape: f32[3], index: 0, kind: input, shape index: {}]   ;;  %s582_s4 = inlined_call_operand.vmem [shape: f32[8,2,256], index: 4, kind: input, shape index: {}]   ;;  %s583_s5 = inlined_call_operand.vmem [shape: f32[8,2,256], index: 5, kind: input, shape index: {}]   ;;  %s584_s6 = inlined_call_operand.hbm [shape: f32[1,1], index: 6, kind: output, shape index: {}]   ;;  %s585_s1 = inlined_call_operand.vmem [shape: f32[8], index: 1, kind: input, shape index: {}]   ;;  %s586_s2 = inlined_call_operand.vmem [shape: f32[8], index: 2, kind: input, shape index: {}]   ;;  %s587_s3 = inlined_call_operand.vmem [shape: f32[8], index: 3, kind: input, shape index: {}]  }
   0x1   :  { %s11_s23 = sshll.u32 %s581_s0, 4  ;;  %s15_s26 = sshll.u32 %s585_s1, 4  ;;  %s12_s23 = int_to_ptr.vmem [resolvable:$true] %s11_s23  ;;  %s16_s26 = int_to_ptr.vmem [resolvable:$true] %s15_s26 }
   0x2   :  { %s386_s27 = scalar_lea.vmem %s12_s23, 16  ;;  %p391_p1 = scmp.lt.s32.totalorder %s12_s23, %s12_s23 }
   0x3   :  { %p387_p0 = scmp.ne.s32.totalorder %s12_s23, %s386_s27  ;;  %p392_p2 = scmp.lt.s32.totalorder %s386_s27, %s386_s27 }
   0x5   :  { %p393_p3 = por %p392_p2, %p391_p1 }
   0x7   :  { %p394_p4 = pnand %p393_p3, %p387_p0 }
   0x9   :  { %397 = shalt.err (!%p394_p4)  }
   0xa   :  { %s474_s28 = smov [#allocation6]   ;;  %s398_s29 = scalar_lea.vmem %s16_s26, 16 }
   0xb   :  { %14 = dma.vmem_to_smem %s12_s23, 16, %s474_s28, [#allocation5] }
   0xc   :  { %p399_p5 = scmp.ne.s32.totalorder %s16_s26, %s398_s29  ;;  %p403_p6 = scmp.lt.s32.totalorder %s16_s26, %s16_s26 }
   0xd   :  { %p404_p7 = scmp.lt.s32.totalorder %s398_s29, %s398_s29 }
   0xf   :  { %p405_p8 = por %p404_p7, %p403_p6 }
  0x11   :  { %p406_p9 = pnand %p405_p8, %p399_p5 }
  0x13   :  { %409 = shalt.err (!%p406_p9)  }
  0x14   :  { %s475_s0 = smov [#allocation7]   ;;  %s19_s7 = sshll.u32 %s586_s2, 4  ;;  %s20_s7 = int_to_ptr.vmem [resolvable:$true] %s19_s7 }
  0x15   :  { %18 = dma.vmem_to_smem %s16_s26, 16, %s475_s0, [#allocation5] }
  0x16   :  { %s23_s10 = sshll.u32 %s587_s3, 4  ;;  %s410_s11 = scalar_lea.vmem %s20_s7, 16  ;;  %s24_s10 = int_to_ptr.vmem [resolvable:$true] %s23_s10 }
  0x17   :  { %p411_p10 = scmp.ne.s32.totalorder %s20_s7, %s410_s11  ;;  %p415_p11 = scmp.lt.s32.totalorder %s20_s7, %s20_s7 }
  0x18   :  { %p416_p12 = scmp.lt.s32.totalorder %s410_s11, %s410_s11 }
  0x1a   :  { %p417_p13 = por %p416_p12, %p415_p11 }
  0x1c   :  { %p418_p0 = pnand %p417_p13, %p411_p10 }
  0x1e   :  { %421 = shalt.err (!%p418_p0)  }
  0x1f   :  { %s476_s12 = smov [#allocation8]   ;;  %s422_s13 = scalar_lea.vmem %s24_s10, 16 }
  0x20   :  { %22 = dma.vmem_to_smem %s20_s7, 16, %s476_s12, [#allocation5] }
  0x21   :  { %p423_p1 = scmp.ne.s32.totalorder %s24_s10, %s422_s13  ;;  %p427_p2 = scmp.lt.s32.totalorder %s24_s10, %s24_s10 }
  0x22   :  { %p428_p3 = scmp.lt.s32.totalorder %s422_s13, %s422_s13 }
  0x24   :  { %p429_p4 = por %p428_p3, %p427_p2 }
  0x26   :  { %p430_p5 = pnand %p429_p4, %p423_p1 }
  0x28   :  { %433 = shalt.err (!%p430_p5)  }
  0x29   :  { %s477_s2 = smov [#allocation9]  }
  0x2a   :  { %26 = dma.vmem_to_smem %s24_s10, 16, %s477_s2, [#allocation5] }
  0x2b   :  { %464 = dma.done.wait [#allocation5], 64 }
  0x2c   :  { %465 = vsyncadd [#allocation5], 4294967232 }
  0x2d   :  { %28 = sfence }
  0x2e   :  { %29 = vsyncpa [#allocation11], 0  ;;  %s528_s3 = smov 0  }
  0x2f LB: > { %s534_s14 = sadd.s32 4294967295, %s472_s3   ;;  %p338_p6 = scmp.ge.s32.totalorder %s472_s3, 1  ;;  %s472_s3 = sphi %s528_s3, %s35_s3  }
  0x30   : > { %p140_p7 = scmp.lt.s32.totalorder %s472_s3, 9 }
  0x32   : > { %p141_p8 = pnand %p338_p6, %p140_p7 }
  0x33   : > { %p162_p9 = scmp.lt.s32.totalorder (!%p141_p8), %s534_s14, 7  ;;  %p343_p10 = scmp.ne.s32.totalorder (!%p141_p8), %s534_s14, 0 }
  0x34   : > { %144 = sbr.rel (%p141_p8) target bundleno = 336 (0x150), region = 28 }
  0x3b   : > { %s163_s15 = scalar_select %p162_p9, %s534_s14, 7 }
  0x3c   : > { %175 = sbr.rel (%p343_p10) target bundleno = 67 (0x43), region = 32  ;;  %vm176_vm0 = vcmask (!%p343_p10), 0   ;;  %v478_v0 = vmov (!%p343_p10), 0.0  }
  0x3d   : > { %s353_s16 = sshll.u32 %s163_s15, 2  ;;  %177 = vst.msk [vmem:[#allocation2] sm:$0x1] (!%p343_p10), %vm176_vm0, %v478_v0  ;;  %178 = vst.msk [vmem:[#allocation3] sm:$0x1] (!%p343_p10), %vm176_vm0, %v478_v0 }
  0x3e   : > { %s166_s19 = scalar_lea.vmem %s582_s4, %s353_s16  ;;  %s171_s22 = scalar_lea.vmem %s583_s5, %s353_s16  ;;  %179 = vst.msk [vmem:[#allocation4] sm:$0x1] (!%p343_p10), %vm176_vm0, %v478_v0 }
  0x43 PF: > { %v345_v1 = vld.sshfl [vmem:[%s166_s19] sm:$0x33 pattern:$0x76325410]  ;;  %vm194_vm1 = vcmask 1041408   ;;  %s236_s23 = sld [smem:[#allocation9 + %s534_s14]] }
  0x44   : > { %v191_v2 = vcombine.high %v345_v1, %v345_v1  ;;  %v195_v3 = vsel %vm194_vm1, %v345_v1, 0.0  ;;  %v346_v4 = vld.sshfl [vmem:[%s171_s22] sm:$0x33 pattern:$0x76325410]  ;;  %vm251_vm2 = vcmask 0  }
  0x45   : > { %v216_v5 = vcombine.high %v346_v4, %v346_v4  ;;  %v219_v7 = vsel %vm194_vm1, %v346_v4, 0.0  ;;  %v257_v11 = vld [vmem:[#allocation4] sm:$0x1]  ;;  %s231_s24 = sld [smem:[#allocation7 + %s534_s14]]  ;;  %v253_v29 = vld [vmem:[#allocation3] sm:$0x1] }
  0x46   : > { %v196_v6 = vsel %vm194_vm1, %v191_v2, 0.0  ;;  %s233_s25 = sld [smem:[#allocation8 + %s534_s14]]  ;;  %s479_s11 = smov 0.0   ;;  %v245_v32 = vld [vmem:[#allocation2] sm:$0x1] }
  0x47   : > { %v197_v8 = vadd.f32 %v196_v6, %v195_v3  ;;  %v220_v9 = vsel %vm194_vm1, %v216_v5, 0.0  ;;  %s180_s27 = sld [smem:[#allocation6]]  ;;  %s344_s28 = sld [smem:[#allocation6 + $0x1]] }
  0x48   : > { %v221_v10 = vadd.f32 %v220_v9, %v219_v7  ;;  %p347_p11 = scmp.ne.s32.totalorder %s534_s14, 7 }
  0x49   : > { %198 = vadd.xlane.f32.xlu0 %v197_v8  ;;  %v237_v12 = vstv %s236_s23  ;;  %s348_s17 = sld [smem:[#allocation6 + $0x2]] (!%p347_p11) }
  0x4a   : > { %v259_v13 = vadd.f32 %v257_v11, %v237_v12  ;;  %382 = vrcp.f32 %v237_v12 }
  0x4c   : > { %260 = vst.msk [vmem:[#allocation4] sm:$0x1] %vm251_vm2, %v259_v13 }
  0x4d   : > { %222 = vadd.xlane.f32.xlu0 %v221_v10 }
  0x4f   : > { %v272_v39 = vstv (!%p347_p11), %s348_s17 }
  0x53   : > { %v269_v35 = vld [vmem:[#allocation4] sm:$0x1] (!%p347_p11) }
  0x54   : > { %v383_v27 = vpop.eup %382  ;;  %384 = vrcp.f32 (!%p347_p11), %v269_v35 }
  0x5e   : > { %v385_v37 = vpop.eup (!%p347_p11), %384 }
  0xd6   : > { %v199_v14 = vpop.xlane.xlu0 %198 }
  0xd7   : > { %v200_v15 = vrot.slane %v199_v14, 4 }
  0xd9   : > { %v201_v16 = vadd.f32 %v200_v15, %v199_v14 }
  0xda   : > { %v223_v17 = vpop.xlane.xlu0 %222 }
  0xdb   : > { %v202_v18 = vrot.slane %v201_v16, 2  ;;  %v224_v19 = vrot.slane %v223_v17, 4 }
  0xdd   : > { %v225_v20 = vadd.f32 %v224_v19, %v223_v17  ;;  %v203_v21 = vadd.f32 %v202_v18, %v201_v16 }
  0xdf   : > { %v226_v22 = vrot.slane %v225_v20, 2  ;;  %v204_v23 = vrot.slane %v203_v21, 1 }
  0xe1   : > { %v227_v24 = vadd.f32 %v226_v22, %v225_v20  ;;  %v205_v25 = vadd.f32 %v204_v23, %v203_v21 }
  0xe3   : > { %355 = vpush %v205_v25  ;;  %v228_v26 = vrot.slane %v227_v24, 1 }
  0xe5   : > { %v229_v28 = vadd.f32 %v228_v26, %v227_v24 }
  0xe7   : > { %357 = vpush %v229_v28 }
  0xe8   : > { %359 = vpush %v383_v27 }
 0x114   : > { %s356_s26 = spop %355 }
 0x115   : > { %s232_s29 = smul.f32 %s356_s26, %s231_s24 }
 0x118   : > { %s358_s0 = spop %357 }
 0x119   : > { %s234_s1 = smul.f32 %s358_s0, %s233_s25  ;;  %s360_s30 = spop %359 }
 0x11b   : > { %s235_s7 = sadd.f32 %s234_s1, %s232_s29 }
 0x11d   : > { %s240_s8 = smul.f32 %s360_s30, %s235_s7  ;;  %v254_v30 = vstv %s235_s7 }
 0x11e   : > { %v255_v31 = vadd.f32 %v254_v30, %v253_v29 }
 0x11f   : > { %s241_s9 = ssub.f32 %s240_s8, %s180_s27 }
 0x120   : > { %s243_s10 = ssub.f32 %s344_s28, %s240_s8  ;;  %256 = vst.msk [vmem:[#allocation3] sm:$0x1] %vm251_vm2, %v255_v31 }
 0x121   : > { %s242_s12 = smax.f32 %s479_s11, %s241_s9 }
 0x122   : > { %s244_s13 = smax.f32 %s479_s11, %s243_s10  ;;  %s246_s2 = smul.f32 %s242_s12, %s242_s12 }
 0x123   : > { %s247_s15 = smul.f32 %s244_s13, %s244_s13 }
 0x124   : > { %264 = sbr.rel (%p347_p11) target bundleno = 311 (0x137), region = 36 }
 0x125   : > { %s248_s16 = sadd.f32 %s247_s15, %s246_s2 }
 0x127   : > { %v249_v33 = vstv %s248_s16  ;;  %v268_v36 = vld [vmem:[#allocation3] sm:$0x1] (!%p347_p11) }
 0x128   : > { %v250_v34 = vadd.f32 %v249_v33, %v245_v32  ;;  %v271_v40 = vmul.f32 (!%p347_p11), %v385_v37, %v268_v36 }
 0x12a   : > { %252 = vst.msk [vmem:[#allocation2] sm:$0x1] %vm251_vm2, %v250_v34  ;;  %v273_v42 = vsub.f32 (!%p347_p11), %v271_v40, %v272_v39 }
 0x12c   : > { %v274_v43 = vmul.f32 %v273_v42, %v273_v42 }
 0x131   : > { %v266_v38 = vld [vmem:[#allocation2] sm:$0x1] }
 0x132   : > { %v267_v41 = vmul.f32 0.125, %v266_v38 }
 0x134   : > { %v275_v44 = vadd.f32 %v274_v43, %v267_v41 }
 0x136   : > { %276 = vst.msk [vmem:[#allocation10] sm:$0x1] %vm251_vm2, %v275_v44 }
 0x137 PF: > { %p365_p12 = scmp.eq.s32.totalorder %s534_s14, 7  ;;  %s480_s18 = smov [#allocation10]  }
 0x138   : > { %s284_s19 = sshll.u32 %s480_s18, 4  ;;  %s285_s19 = int_to_ptr.vmem [resolvable:$true] %s284_s19 }
 0x139   : > { %s434_s20 = scalar_lea.vmem %s285_s19, 16  ;;  %s440_s21 = scalar_lea.vmem %s285_s19, 32 }
 0x13a   : > { %p435_p13 = scmp.ne.s32.totalorder %s285_s19, %s434_s20  ;;  %p441_p2 = scmp.lt.s32.totalorder %s285_s19, %s285_s19 }
 0x13b   : > { %p442_p3 = scmp.lt.s32.totalorder %s440_s21, %s434_s20 }
 0x13c   : > { %p436_p0 = pnand %p435_p13, %p365_p12 }
 0x13d   : > { %p443_p4 = por %p442_p3, %p441_p2 }
 0x13e   : > { %p437_p1 = pneg %p436_p0 }
 0x140   : > { %p444_p5 = pnand %p443_p4, %p437_p1 }
 0x142   : > { %447 = shalt.err (!%p444_p5)
}
 0x143   : > { %s448_s24 = scalar_lea.hbm %s584_s6, 16 }
 0x144   : > { %p449_p6 = scmp.ne.s32.totalorder %s584_s6, %s448_s24  ;;  %p454_p9 = scmp.lt.u32.totalorder %s448_s24, %s584_s6 }
 0x146   : > { %p450_p7 = pnand %p449_p6, %p365_p12 }
 0x148   : > { %p451_p8 = pneg %p450_p7 }
 0x14a   : > { %p456_p10 = pnand %p454_p9, %p451_p8 }
 0x14c   : > { %459 = shalt.err (!%p456_p10)
}
 0x14d   : > { %362 = dma.vmem_to_hbm [thread:$0]  (%p365_p12), %s285_s19, 16, %s584_s6, [#allocation11]  }
 0x14e   : > { %467 = dma.done.wait (%p365_p12), [#allocation11], 16  }
 0x14f   : > { %469 = vsyncadd (%p365_p12), [#allocation11], 4294967280 }
 0x150 PF: > { %s35_s3 = sadd.s32 1, %s472_s3  }
 0x151   : > { %p32_p11 = scmp.ge.s32.totalorder %s35_s3, 10  }
 0x153   :  { %34 = sbr.rel (!%p32_p11) target bundleno = 47 (0x2f), region = 66 }
 0x15a   :  { %297 = vsyncpa [#allocation11], 1 }
 0x15b   :  { %299 = vsyncpa [#allocation11 + $0x1], 1 }

</bundles_post_ra>
